<compile_context>
chip_gen: v6e
topology: v6e:2x2x1
jax: 0.10.0
libtpu: 0.0.40
codegen_flags: <defaults>
</compile_context>

<pallas_src>
import jax
import jax.numpy as jnp
from jax.experimental import pallas as pl
from jax.experimental.pallas import tpu as pltpu

_LANES = 128
_MAX_TILE_ROWS = 2048   # (2048, 128) f32 tile = 1 MiB; ~4 MiB with in+out double-buffering
_MIN_SPLIT_ROWS = 16    # at/below this, a single full-array block


def _linear_kernel(p_ref, x_ref, o_ref):
    # p_ref: SMEM (2,) f32 -> [w, b]; x_ref / o_ref: (tile_rows, 128) VMEM tiles.
    w = p_ref[0]
    b = p_ref[1]
    o_ref[...] = (x_ref[...] * w + b).astype(o_ref.dtype)


def _pick_tile_rows(rows: int) -> int:
    if rows <= _MIN_SPLIT_ROWS:
        return rows                      # single block == full array (any row count is legal)
    half = -(-rows // 2)                 # ceil(rows / 2): >= 2 grid steps (v7x dual-TC sharding)
    half = -(-half // 8) * 8             # round up to the sublane multiple (8)
    return min(_MAX_TILE_ROWS, half)


def linear_forward(x, weight, bias):
    """x: (N, 1) f32, weight: (1, 1) f32, bias: (1,) f32 -> (N, 1) f32."""
    n, f = x.shape
    assert f == 1 and weight.shape == (1, 1) and bias.shape == (1,)

    # Scalars stay in f32 in SMEM regardless of the activation dtype.
    params = jnp.concatenate([weight.reshape(1), bias.reshape(1)]).astype(jnp.float32)

    x_flat = x.reshape(-1)               # free
    rem = n % _LANES
    padded = rem != 0
    if padded:
        # Ragged N: pad only to the next 128-lane boundary (<= 127 extra elements).
        x_flat = jnp.pad(x_flat, (0, _LANES - rem))
    rows = x_flat.shape[0] // _LANES
    x2d = x_flat.reshape(rows, _LANES)   # free bitcast when N % 128 == 0

    tile_rows = _pick_tile_rows(rows)
    grid = (pl.cdiv(rows, tile_rows),)   # Pallas clips the ragged last block; no zero rows streamed

    y2d = pl.pallas_call(
        _linear_kernel,
        out_shape=jax.ShapeDtypeStruct((rows, _LANES), x.dtype),
        grid_spec=pl.GridSpec(
            grid=grid,
            in_specs=[
                pl.BlockSpec(memory_space=pltpu.MemorySpace.SMEM),    # packed [w, b]
                pl.BlockSpec((tile_rows, _LANES), lambda i: (i, 0)),  # x tile
            ],
            out_specs=pl.BlockSpec((tile_rows, _LANES), lambda i: (i, 0)),
        ),
        compiler_params=pltpu.CompilerParams(
            dimension_semantics=("parallel",),
        ),
        cost_estimate=pl.CostEstimate(
            flops=2 * rows * _LANES,
            transcendentals=0,
            bytes_accessed=8 * rows * _LANES,
        ),
    )(params, x2d)

    if padded:
        return y2d.reshape(-1)[:n].reshape(n, 1)
    return y2d.reshape(n, 1)             # free


if __name__ == "__main__":
    key = jax.random.PRNGKey(0)
    kw, kb, kx = jax.random.split(key, 3)

    # Deterministic parameter init mimicking torch.nn.Linear(1, 1):
    # uniform(-1/sqrt(in_features), 1/sqrt(in_features)) with in_features = 1.
    weight = jax.random.uniform(kw, (1, 1), jnp.float32, minval=-1.0, maxval=1.0)
    bias = jax.random.uniform(kb, (1,), jnp.float32, minval=-1.0, maxval=1.0)

    def ref(xs):  # elementwise reference for Linear(1, 1)
        return xs * weight[0, 0] + bias[0]

    # Small input matching the script's x = np.linspace(0, 25, 100), as a (N, 1) batch.
    x = jnp.linspace(0.0, 25.0, 100, dtype=jnp.float32).reshape(-1, 1)
    y = linear_forward(x, weight, bias)
    jax.block_until_ready(y)
    assert y.shape == (100, 1)
    assert jnp.allclose(y, ref(x), rtol=1e-6, atol=1e-6), "mismatch (small ragged N)"

    # Ragged large N: multi-block grid with a clipped (ragged) last block.
    x_big = jnp.linspace(0.0, 25.0, 70000, dtype=jnp.float32).reshape(-1, 1)
    y_big = linear_forward(x_big, weight, bias)
    jax.block_until_ready(y_big)
    assert y_big.shape == (70000, 1)
    assert jnp.allclose(y_big, ref(x_big), rtol=1e-6, atol=1e-6), "mismatch (large ragged N)"

    # 128-aligned large N: zero-copy (no pad, no slice) path with the 2048-row tile cap.
    n_al = 5000 * 128
    x_al = jax.random.uniform(kx, (n_al, 1), jnp.float32, minval=0.0, maxval=25.0)
    y_al = linear_forward(x_al, weight, bias)
    jax.block_until_ready(y_al)
    assert y_al.shape == (n_al, 1)
    assert jnp.allclose(y_al, ref(x_al), rtol=1e-6, atol=1e-6), "mismatch (aligned large N)"

    print("KERNEL_OK")
</pallas_src>

<mosaic_0001>
module attributes {stable_mosaic.version = 11 : i64} {
  func.func @_linear_kernel(%arg0: i32, %arg1: memref<2xf32, #tpu.memory_space<smem>>, %arg2: memref<1x128xf32, #tpu.memory_space<vmem>>, %arg3: memref<1x128xf32, #tpu.memory_space<vmem>>) attributes {dimension_semantics = [#tpu.dimension_semantics<parallel>], iteration_bounds = array<i64: 1>, scalar_prefetch = 0 : i64, scratch_operands = 0 : i64, tpu.core_type = #tpu.core_type<tc>, window_params = [{transform_indices = @transform_0, window_bounds = array<i64: 2>}, {transform_indices = @transform_1, window_bounds = array<i64: 1, 128>}, {transform_indices = @transform_2, window_bounds = array<i64: 1, 128>}]} {
    %c0 = arith.constant 0 : index
    %0 = memref.load %arg1[%c0] : memref<2xf32, #tpu.memory_space<smem>>
    %c1 = arith.constant 1 : index
    %1 = memref.load %arg1[%c1] : memref<2xf32, #tpu.memory_space<smem>>
    %c0_0 = arith.constant 0 : index
    %c0_1 = arith.constant 0 : index
    %2 = vector.load %arg2[%c0_0, %c0_1] : memref<1x128xf32, #tpu.memory_space<vmem>>, vector<1x128xf32>
    %3 = vector.broadcast %0 : f32 to vector<1x128xf32>
    %4 = arith.mulf %2, %3 : vector<1x128xf32>
    %5 = vector.broadcast %1 : f32 to vector<1x128xf32>
    %6 = arith.addf %4, %5 : vector<1x128xf32>
    %c0_2 = arith.constant 0 : index
    %c0_3 = arith.constant 0 : index
    %7 = vector.load %arg3[%c0_2, %c0_3] : memref<1x128xf32, #tpu.memory_space<vmem>>, vector<1x128xf32>
    tpu.vector_store %arg3[%c0_2, %c0_3], %6 {strides = array<i32>} : memref<1x128xf32, #tpu.memory_space<vmem>>, vector<1x128xf32>,
    return
  }
  func.func @transform_0(%arg0: i32) -> i32 {
    %c0_i32 = arith.constant 0 : i32
    %c0_i32_0 = arith.constant 0 : i32
    return %c0_i32 : i32
  }
  func.func @transform_1(%arg0: i32) -> (i32, i32) {
    %c0_i32 = arith.constant 0 : i32
    %c0_i32_0 = arith.constant 0 : i32
    return %arg0, %c0_i32 : i32, i32
  }
  func.func @transform_2(%arg0: i32) -> (i32, i32) {
    %c0_i32 = arith.constant 0 : i32
    %c0_i32_0 = arith.constant 0 : i32
    return %arg0, %c0_i32 : i32, i32
  }
}

</mosaic_0001>

<bundles_post_ra>
// kernel: tpu_custom_call.1
= control target key start
LH: loop header
LB: loop body
LE: loop exit
PB: predicated region body
PF: predicated region fallthrough
CT: control target
= control target key end

     0   :  { %7 = vsyncpa [#allocation4], 0  ;;  %s107_s0 = inlined_call_operand.hbm [shape: f32[2], index: 0, kind: input, shape index: {}]   ;;  %s108_s1 = inlined_call_operand.vmem [shape: f32[1,128], index: 1, kind: input, shape index: {}]   ;;  %s109_s2 = inlined_call_operand.hbm [shape: f32[1,128], index: 2, kind: output, shape index: {}]  }
   0x1   :  { %8 = vsyncpa [#allocation3], 0  ;;  %s81_s9 = smov [#allocation2]  }
   0x2   :  { %16 = dma.hbm_to_smem %s107_s0, 16, %s81_s9, [#allocation4]  }
   0x3   :  { %77 = dma.done.wait [#allocation4], 16  }
   0x4   :  { %78 = vsyncadd [#allocation4], 4294967280 }
   0x5   :  { %22 = sfence }
   0x6   :  { %s23_s12 = sld [smem:[#allocation2]]  ;;  %v25_v0 = vld [vmem:[%s108_s1] sm:$0x1]  ;;  %s82_s16 = smov [#allocation5]  }
   0x7   :  { %s46_s13 = sld [smem:[#allocation2 + $0x1]]  ;;  %s37_s17 = sshll.u32 %s82_s16, 4  ;;  %s38_s17 = int_to_ptr.vmem [resolvable:$true] %s37_s17 }
   0x8   :  { %s57_s18 = scalar_lea.vmem %s38_s17, 16  ;;  %s61_s0 = scalar_lea.vmem %s38_s17, 32 }
   0x9   :  { %p58_p0 = scmp.ne.s32.totalorder %s38_s17, %s57_s18  ;;  %p62_p1 = scmp.lt.s32.totalorder %s38_s17, %s38_s17 }
   0xa   :  { %p63_p2 = scmp.lt.s32.totalorder %s61_s0, %s57_s18 }
   0xc   :  { %v26_v1 = vstv %s23_s12  ;;  %p64_p3 = por %p63_p2, %p62_p1 }
   0xd   :  { %v27_v2 = vmul.f32 %v26_v1, %v25_v0  ;;  %v28_v3 = vstv %s46_s13 }
   0xe   :  { %p65_p4 = pnand %p64_p3, %p58_p0 }
   0xf   :  { %v29_v4 = vadd.f32 %v28_v3, %v27_v2 }
  0x11   :  { %30 = vst [vmem:[#allocation5] sm:$0x1] %v29_v4 }
  0x12   :  { %68 = shalt.err (!%p65_p4)
}
  0x13   :  { %40 = dma.vmem_to_hbm [thread:$0]  %s38_s17, 16, %s109_s2, [#allocation3]  }
  0x14   :  { %79 = dma.done.wait [#allocation3], 16  }
  0x15   :  { %80 = vsyncadd [#allocation3], 4294967280 }
  0x16   :  { %44 = vsyncpa [#allocation3], 1 }
  0x17   :  { %45 = vsyncpa [#allocation4], 1 }

</bundles_post_ra>
